<compile_context>
chip_gen: v7x
topology: tpu7x:2x2x1
jax: 0.10.0
libtpu: 0.0.40
codegen_flags: <defaults>
</compile_context>

<pallas_src>
import jax
import jax.numpy as jnp
from jax.experimental import pallas as pl
from jax.experimental.pallas import tpu as pltpu

# ---- small stand-in hyper-parameters consistent with the module's forward ----
INPUT_SIZE = 2
HIDDEN_SIZE = 32      # stand-in for hidden_size=100 (pad to 128 for the real model)
NUM_LAYERS = 2
OUTPUT_SIZE = 3
BATCH = 2
SEQ_LEN = 8


def _lstm_kernel(x2d_ref,        # (B*T, I)   rows ordered b*T + t
                 wih0w_ref,      # (I, 8H)    layer-0 input proj, wave layout (g cols x2)
                 bw_ref,         # (1, 8H)    [b0 | b1] in wave layout (g cols x2)
                 ww_ref,         # (2H, 8H)   wavefront recurrent weight (g cols x2)
                 wfcw_ref,       # (2H, O)    fc weight^T, zero over the h0 rows
                 bfc_ref,        # (1, O)
                 out_ref):       # (B, O)
    H2, H8 = ww_ref.shape        # 2H, 8H
    H = H2 // 2
    B = out_ref.shape[0]
    T = x2d_ref.shape[0] // B

    w_wave = ww_ref[...]
    # Hoisted broadcast of the bias row (used as the last wavefront addend).
    b_last = jnp.broadcast_to(bw_ref[...], (B, H8))

    # Hoisted layer-0 input projection, already in the packed gate-major 8H
    # layout: layer-0 gate columns = x_t @ Wih0^T + b0 (g cols pre-scaled x2),
    # layer-1 gate columns = b1.  One MXU dot for all timesteps.
    xg = (jnp.dot(x2d_ref[...], wih0w_ref[...],
                  preferred_element_type=jnp.float32)
          + bw_ref[...])                               # (B*T, 8H)
    xg = xg.reshape(B, T, H8)

    # ---- peeled step 0: h0_{-1}=0 (no recurrent dot), c0_{-1}=0 (no f*c) ----
    s0 = jax.nn.sigmoid(xg[:, 0, :])
    c0 = s0[:, 0:H] * (2.0 * s0[:, 4 * H:5 * H] - 1.0)     # i0 * tanh-equiv(g0)
    h0 = s0[:, 6 * H:7 * H] * jnp.tanh(c0)                 # o0 * tanh(c0)
    zH = jnp.zeros((B, H), jnp.float32)
    h_p = jnp.concatenate([h0, zH], axis=1)                # [h0_0 | h1_{-1}=0]
    c_p = jnp.concatenate([c0, zH], axis=1)                # [c0_0 | c1_{-1}=0]

    # ---- wavefront loop: step w advances layer-1 to step w and layer-0 to
    #      step w+1 with a single fused MXU dot per iteration (fully unrolled).
    for w in range(T):
        addend = xg[:, w + 1, :] if w + 1 < T else b_last
        g = jnp.dot(h_p, w_wave, preferred_element_type=jnp.float32) + addend
        s = jax.nn.sigmoid(g)                              # one wide sigmoid, (B, 8H)
        i_p = s[:, 0:2 * H]                                # [i0_{w+1} | i1_w]
        f_p = s[:, 2 * H:4 * H]
        g_p = 2.0 * s[:, 4 * H:6 * H] - 1.0                # tanh via 2*sigmoid(2x)-1
        o_p = s[:, 6 * H:8 * H]
        c_p = f_p * c_p + i_p * g_p                        # packed [c0 | c1]
        h_p = o_p * jnp.tanh(c_p)                          # one tanh push, both layers

    # fc on h1_{T-1}: the fc weight is zero-padded over the h0 rows so the
    # packed carry feeds the MXU directly (no lane extraction).
    out_ref[...] = (jnp.dot(h_p, wfcw_ref[...], preferred_element_type=jnp.float32)
                    + bfc_ref[...])


def simple_lstm_forward(x, kparams):
    """x: (B, T, input_size) float32 (PyTorch batch_first layout)."""
    B, T, I = x.shape
    # Contiguous reshape only (metadata-level) -- no transpose in front of a
    # microsecond-scale kernel.
    x2d = x.reshape(B * T, I)

    operands = (
        x2d,
        kparams["wih0_wave"], kparams["b_wave"], kparams["w_wave"],
        kparams["wfc_wave"], kparams["bfc"],
    )

    vmem_spec = pl.BlockSpec(memory_space=pltpu.MemorySpace.VMEM)
    # No grid: total working set is ~100 KB, so everything sits in VMEM and a
    # BlockSpec pipeline would only add per-step overhead on every generation.
    out = pl.pallas_call(
        _lstm_kernel,
        out_shape=jax.ShapeDtypeStruct((B, OUTPUT_SIZE), jnp.float32),
        in_specs=[vmem_spec] * len(operands),
        out_specs=vmem_spec,
    )(*operands)
    return out


def init_params(key):
    """Deterministic init mirroring PyTorch's U(-1/sqrt(H), 1/sqrt(H)).

    Returns (kernel_params, ref_params):
      * kernel_params: wavefront-packed, gate-major [i0 i1 f0 f1 g0 g1 o0 o1]
        column layout with the g-gate columns pre-scaled by 2 (for the
        tanh(x) = 2*sigmoid(2x)-1 rewrite).
      * ref_params: plain transposed PyTorch weights for the pure-JAX reference.
    """
    H, I, O = HIDDEN_SIZE, INPUT_SIZE, OUTPUT_SIZE
    bound = 1.0 / jnp.sqrt(jnp.float32(H))
    keys = jax.random.split(key, 10)

    def u(k, shape):
        return jax.random.uniform(k, shape, jnp.float32, -bound, bound)

    # PyTorch stores weight_ih_l{k}: (4H, in), weight_hh_l{k}: (4H, H).
    wih0 = u(keys[0], (4 * H, I))
    whh0 = u(keys[1], (4 * H, H))
    b_ih0 = u(keys[2], (4 * H,))
    b_hh0 = u(keys[3], (4 * H,))
    wih1 = u(keys[4], (4 * H, H))
    whh1 = u(keys[5], (4 * H, H))
    b_ih1 = u(keys[6], (4 * H,))
    b_hh1 = u(keys[7], (4 * H,))
    wfc = u(keys[8], (O, H))
    bfc = u(keys[9], (O,))

    b0 = b_ih0 + b_hh0
    b1 = b_ih1 + b_hh1

    ref_params = {
        "wih0_t": wih0.T, "whh0_t": whh0.T, "b0": b0[None, :],
        "wih1_t": wih1.T, "whh1_t": whh1.T, "b1": b1[None, :],
        "wfc_t": wfc.T, "bfc": bfc[None, :],
    }

    def scale_g(w_t):
        # Pre-scale the g-gate columns (2H:3H in [i f g o] order) by 2 so the
        # kernel can use tanh(x) = 2*sigmoid(2x) - 1 (exact math).
        return w_t.at[..., 2 * H:3 * H].multiply(2.0)

    def to_wave(w_t, layer):
        # (X, 4H) in [i f g o] order -> (X, 8H) gate-major
        # [i0 i1 f0 f1 g0 g1 o0 o1], with the other layer's columns zeroed.
        X = w_t.shape[0]
        blocks = w_t.reshape(X, 4, H)
        out = jnp.zeros((X, 4, 2, H), w_t.dtype)
        out = out.at[:, :, layer, :].set(blocks)
        return out.reshape(X, 8 * H)

    # Layer-0 input projection weight / combined biases in wave layout.
    wih0_wave = to_wave(scale_g(wih0.T), 0)                              # (I, 8H)
    b_wave = (to_wave(scale_g(b0[None, :]), 0)
              + to_wave(scale_g(b1[None, :]), 1))                        # (1, 8H)

    # Wavefront recurrent weight: rows 0:H multiply h0_t, rows H:2H multiply
    # h1_{t-1}.  Layer-0 columns get Whh0^T (and 0), layer-1 columns get
    # Wih1^T and Whh1^T.
    w_wave = jnp.concatenate(
        [to_wave(scale_g(whh0.T), 0) + to_wave(scale_g(wih1.T), 1),      # h0 rows
         to_wave(scale_g(whh1.T), 1)],                                   # h1 rows
        axis=0)                                                          # (2H, 8H)

    # fc weight zero-padded over the h0 rows so the packed (B, 2H) carry is
    # the dot lhs directly.
    wfc_wave = jnp.concatenate([jnp.zeros((H, O), jnp.float32), wfc.T], axis=0)

    kernel_params = {
        "wih0_wave": wih0_wave,
        "b_wave": b_wave,
        "w_wave": w_wave,
        "wfc_wave": wfc_wave,
        "bfc": bfc[None, :],
    }
    return kernel_params, ref_params


def reference_forward(x, p):
    """Pure-JAX reference of the same stacked-LSTM + fc forward pass
    (mirrors PyTorch's per-step, per-gate formulation with unfused weights)."""
    B, T, _ = x.shape
    H = HIDDEN_SIZE
    h0 = c0 = h1 = c1 = jnp.zeros((B, H), jnp.float32)

    def gates_to_hc(g, c_prev):
        i = jax.nn.sigmoid(g[:, 0 * H:1 * H])
        f = jax.nn.sigmoid(g[:, 1 * H:2 * H])
        gg = jnp.tanh(g[:, 2 * H:3 * H])
        o = jax.nn.sigmoid(g[:, 3 * H:4 * H])
        c_new = f * c_prev + i * gg
        return o * jnp.tanh(c_new), c_new

    for t in range(T):
        x_t = x[:, t, :]
        g0 = x_t @ p["wih0_t"] + h0 @ p["whh0_t"] + p["b0"]
        h0, c0 = gates_to_hc(g0, c0)
        g1 = h0 @ p["wih1_t"] + h1 @ p["whh1_t"] + p["b1"]
        h1, c1 = gates_to_hc(g1, c1)
    return h1 @ p["wfc_t"] + p["bfc"]


if __name__ == "__main__":
    key = jax.random.PRNGKey(0)
    k_param, k_x = jax.random.split(key)
    kernel_params, ref_params = init_params(k_param)
    x = jax.random.normal(k_x, (BATCH, SEQ_LEN, INPUT_SIZE), jnp.float32)

    out = simple_lstm_forward(x, kernel_params)
    out = jax.block_until_ready(out)

    ref = reference_forward(x, ref_params)
    assert out.shape == (BATCH, OUTPUT_SIZE)
    assert jnp.allclose(out, ref, atol=1e-4, rtol=1e-4), (out, ref)

    print("KERNEL_OK")
</pallas_src>

<mosaic_0001>
module attributes {stable_mosaic.version = 11 : i64} {
  func.func @_lstm_kernel(%arg0: memref<16x2xf32, #tpu.memory_space<vmem>>, %arg1: memref<2x256xf32, #tpu.memory_space<vmem>>, %arg2: memref<1x256xf32, #tpu.memory_space<vmem>>, %arg3: memref<64x256xf32, #tpu.memory_space<vmem>>, %arg4: memref<64x3xf32, #tpu.memory_space<vmem>>, %arg5: memref<1x3xf32, #tpu.memory_space<vmem>>, %arg6: memref<2x3xf32, #tpu.memory_space<vmem>>) attributes {dimension_semantics = [], scalar_prefetch = 0 : i64, scratch_operands = 0 : i64, tpu.core_type = #tpu.core_type<tc>} {
    %c0 = arith.constant 0 : index
    %c0_0 = arith.constant 0 : index
    %0 = vector.load %arg3[%c0, %c0_0] : memref<64x256xf32, #tpu.memory_space<vmem>>, vector<64x256xf32>
    %c0_1 = arith.constant 0 : index
    %c0_2 = arith.constant 0 : index
    %1 = vector.load %arg2[%c0_1, %c0_2] : memref<1x256xf32, #tpu.memory_space<vmem>>, vector<1x256xf32>
    %2 = vector.shape_cast %1 : vector<1x256xf32> to vector<1x256xf32>
    %3 = vector.broadcast %2 : vector<1x256xf32> to vector<2x256xf32>
    %c0_3 = arith.constant 0 : index
    %c0_4 = arith.constant 0 : index
    %4 = vector.load %arg0[%c0_3, %c0_4] : memref<16x2xf32, #tpu.memory_space<vmem>>, vector<16x2xf32>
    %c0_5 = arith.constant 0 : index
    %c0_6 = arith.constant 0 : index
    %5 = vector.load %arg1[%c0_5, %c0_6] : memref<2x256xf32, #tpu.memory_space<vmem>>, vector<2x256xf32>
    %cst = arith.constant dense<0.000000e+00> : vector<16x256xf32>
    %6 = tpu.matmul %4, %5, %cst {dimension_numbers = #tpu.dot_dimension_numbers<[1], [0], [0], [1], [0, 0, 1, 1], [], []>} : vector<16x2xf32>, vector<2x256xf32>, vector<16x256xf32> -> vector<16x256xf32>
    %c0_7 = arith.constant 0 : index
    %c0_8 = arith.constant 0 : index
    %7 = vector.load %arg2[%c0_7, %c0_8] : memref<1x256xf32, #tpu.memory_space<vmem>>, vector<1x256xf32>
    %8 = vector.broadcast %7 : vector<1x256xf32> to vector<16x256xf32>
    %9 = arith.addf %6, %8 : vector<16x256xf32>
    %10 = vector.shape_cast %9 : vector<16x256xf32> to vector<2x8x256xf32>
    %11 = vector.extract_strided_slice %10 {offsets = [0, 0, 0], sizes = [2, 1, 256], strides = [1, 1, 1]} : vector<2x8x256xf32> to vector<2x1x256xf32>
    %12 = vector.shape_cast %11 : vector<2x1x256xf32> to vector<2x256xf32>
    %13 = arith.negf %12 : vector<2x256xf32>
    %14 = math.exp %13 : vector<2x256xf32>
    %cst_9 = arith.constant 1.000000e+00 : f32
    %15 = vector.broadcast %cst_9 : f32 to vector<2x256xf32>
    %16 = arith.addf %15, %14 : vector<2x256xf32>
    %17 = arith.divf %15, %16 : vector<2x256xf32>
    %18 = vector.extract_strided_slice %17 {offsets = [0, 0], sizes = [2, 32], strides = [1, 1]} : vector<2x256xf32> to vector<2x32xf32>
    %19 = vector.extract_strided_slice %17 {offsets = [0, 128], sizes = [2, 32], strides = [1, 1]} : vector<2x256xf32> to vector<2x32xf32>
    %cst_10 = arith.constant 2.000000e+00 : f32
    %20 = vector.broadcast %cst_10 : f32 to vector<2x32xf32>
    %21 = arith.mulf %20, %19 : vector<2x32xf32>
    %cst_11 = arith.constant 1.000000e+00 : f32
    %22 = vector.broadcast %cst_11 : f32 to vector<2x32xf32>
    %23 = arith.subf %21, %22 : vector<2x32xf32>
    %24 = arith.mulf %18, %23 : vector<2x32xf32>
    %25 = vector.extract_strided_slice %17 {offsets = [0, 192], sizes = [2, 32], strides = [1, 1]} : vector<2x256xf32> to vector<2x32xf32>
    %26 = math.tanh %24 : vector<2x32xf32>
    %27 = arith.mulf %25, %26 : vector<2x32xf32>
    %cst_12 = arith.constant 0.000000e+00 : f32
    %28 = vector.broadcast %cst_12 : f32 to vector<2x32xf32>
    %29 = tpu.concatenate %27, %28 in 1 : vector<2x32xf32>, vector<2x32xf32> -> vector<2x64xf32>
    %30 = tpu.concatenate %24, %28 in 1 : vector<2x32xf32>, vector<2x32xf32> -> vector<2x64xf32>
    %31 = vector.extract_strided_slice %10 {offsets = [0, 1, 0], sizes = [2, 1, 256], strides = [1, 1, 1]} : vector<2x8x256xf32> to vector<2x1x256xf32>
    %32 = vector.shape_cast %31 : vector<2x1x256xf32> to vector<2x256xf32>
    %cst_13 = arith.constant dense<0.000000e+00> : vector<2x256xf32>
    %33 = tpu.matmul %29, %0, %cst_13 {dimension_numbers = #tpu.dot_dimension_numbers<[1], [0], [0], [1], [0, 0, 1, 1], [], []>} : vector<2x64xf32>, vector<64x256xf32>, vector<2x256xf32> -> vector<2x256xf32>
    %34 = arith.addf %33, %32 : vector<2x256xf32>
    %35 = arith.negf %34 : vector<2x256xf32>
    %36 = math.exp %35 : vector<2x256xf32>
    %cst_14 = arith.constant 1.000000e+00 : f32
    %37 = vector.broadcast %cst_14 : f32 to vector<2x256xf32>
    %38 = arith.addf %37, %36 : vector<2x256xf32>
    %39 = arith.divf %37, %38 : vector<2x256xf32>
    %40 = vector.extract_strided_slice %39 {offsets = [0, 0], sizes = [2, 64], strides = [1, 1]} : vector<2x256xf32> to vector<2x64xf32>
    %41 = vector.extract_strided_slice %39 {offsets = [0, 64], sizes = [2, 64], strides = [1, 1]} : vector<2x256xf32> to vector<2x64xf32>
    %42 = vector.extract_strided_slice %39 {offsets = [0, 128], sizes = [2, 64], strides = [1, 1]} : vector<2x256xf32> to vector<2x64xf32>
    %cst_15 = arith.constant 2.000000e+00 : f32
    %43 = vector.broadcast %cst_15 : f32 to vector<2x64xf32>
    %44 = arith.mulf %43, %42 : vector<2x64xf32>
    %cst_16 = arith.constant 1.000000e+00 : f32
    %45 = vector.broadcast %cst_16 : f32 to vector<2x64xf32>
    %46 = arith.subf %44, %45 : vector<2x64xf32>
    %47 = vector.extract_strided_slice %39 {offsets = [0, 192], sizes = [2, 64], strides = [1, 1]} : vector<2x256xf32> to vector<2x64xf32>
    %48 = arith.mulf %41, %30 : vector<2x64xf32>
    %49 = arith.mulf %40, %46 : vector<2x64xf32>
    %50 = arith.addf %48, %49 : vector<2x64xf32>
    %51 = math.tanh %50 : vector<2x64xf32>
    %52 = arith.mulf %47, %51 : vector<2x64xf32>
    %53 = vector.extract_strided_slice %10 {offsets = [0, 2, 0], sizes = [2, 1, 256], strides = [1, 1, 1]} : vector<2x8x256xf32> to vector<2x1x256xf32>
    %54 = vector.shape_cast %53 : vector<2x1x256xf32> to vector<2x256xf32>
    %cst_17 = arith.constant dense<0.000000e+00> : vector<2x256xf32>
    %55 = tpu.matmul %52, %0, %cst_17 {dimension_numbers = #tpu.dot_dimension_numbers<[1], [0], [0], [1], [0, 0, 1, 1], [], []>} : vector<2x64xf32>, vector<64x256xf32>, vector<2x256xf32> -> vector<2x256xf32>
    %56 = arith.addf %55, %54 : vector<2x256xf32>
    %57 = arith.negf %56 : vector<2x256xf32>
    %58 = math.exp %57 : vector<2x256xf32>
    %cst_18 = arith.constant 1.000000e+00 : f32
    %59 = vector.broadcast %cst_18 : f32 to vector<2x256xf32>
    %60 = arith.addf %59, %58 : vector<2x256xf32>
    %61 = arith.divf %59, %60 : vector<2x256xf32>
    %62 = vector.extract_strided_slice %61 {offsets = [0, 0], sizes = [2, 64], strides = [1, 1]} : vector<2x256xf32> to vector<2x64xf32>
    %63 = vector.extract_strided_slice %61 {offsets = [0, 64], sizes = [2, 64], strides = [1, 1]} : vector<2x256xf32> to vector<2x64xf32>
    %64 = vector.extract_strided_slice %61 {offsets = [0, 128], sizes = [2, 64], strides = [1, 1]} : vector<2x256xf32> to vector<2x64xf32>
    %cst_19 = arith.constant 2.000000e+00 : f32
    %65 = vector.broadcast %cst_19 : f32 to vector<2x64xf32>
    %66 = arith.mulf %65, %64 : vector<2x64xf32>
    %cst_20 = arith.constant 1.000000e+00 : f32
    %67 = vector.broadcast %cst_20 : f32 to vector<2x64xf32>
    %68 = arith.subf %66, %67 : vector<2x64xf32>
    %69 = vector.extract_strided_slice %61 {offsets = [0, 192], sizes = [2, 64], strides = [1, 1]} : vector<2x256xf32> to vector<2x64xf32>
    %70 = arith.mulf %63, %50 : vector<2x64xf32>
    %71 = arith.mulf %62, %68 : vector<2x64xf32>
    %72 = arith.addf %70, %71 : vector<2x64xf32>
    %73 = math.tanh %72 : vector<2x64xf32>
    %74 = arith.mulf %69, %73 : vector<2x64xf32>
    %75 = vector.extract_strided_slice %10 {offsets = [0, 3, 0], sizes = [2, 1, 256], strides = [1, 1, 1]} : vector<2x8x256xf32> to vector<2x1x256xf32>
    %76 = vector.shape_cast %75 : vector<2x1x256xf32> to vector<2x256xf32>
    %cst_21 = arith.constant dense<0.000000e+00> : vector<2x256xf32>
    %77 = tpu.matmul %74, %0, %cst_21 {dimension_numbers = #tpu.dot_dimension_numbers<[1], [0], [0], [1], [0, 0, 1, 1], [], []>} : vector<2x64xf32>, vector<64x256xf32>, vector<2x256xf32> -> vector<2x256xf32>
    %78 = arith.addf %77, %76 : vector<2x256xf32>
    %79 = arith.negf %78 : vector<2x256xf32>
    %80 = math.exp %79 : vector<2x256xf32>
    %cst_22 = arith.constant 1.000000e+00 : f32
    %81 = vector.broadcast %cst_22 : f32 to vector<2x256xf32>
    %82 = arith.addf %81, %80 : vector<2x256xf32>
    %83 = arith.divf %81, %82 : vector<2x256xf32>
    %84 = vector.extract_strided_slice %83 {offsets = [0, 0], sizes = [2, 64], strides = [1, 1]} : vector<2x256xf32> to vector<2x64xf32>
    %85 = vector.extract_strided_slice %83 {offsets = [0, 64], sizes = [2, 64], strides = [1, 1]} : vector<2x256xf32> to vector<2x64xf32>
    %86 = vector.extract_strided_slice %83 {offsets = [0, 128], sizes = [2, 64], strides = [1, 1]} : vector<2x256xf32> to vector<2x64xf32>
    %cst_23 = arith.constant 2.000000e+00 : f32
    %87 = vector.broadcast %cst_23 : f32 to vector<2x64xf32>
    %88 = arith.mulf %87, %86 : vector<2x64xf32>
    %cst_24 = arith.constant 1.000000e+00 : f32
    %89 = vector.broadcast %cst_24 : f32 to vector<2x64xf32>
    %90 = arith.subf %88, %89 : vector<2x64xf32>
    %91 = vector.extract_strided_slice %83 {offsets = [0, 192], sizes = [2, 64], strides = [1, 1]} : vector<2x256xf32> to vector<2x64xf32>
    %92 = arith.mulf %85, %72 : vector<2x64xf32>
    %93 = arith.mulf %84, %90 : vector<2x64xf32>
    %94 = arith.addf %92, %93 : vector<2x64xf32>
    %95 = math.tanh %94 : vector<2x64xf32>
    %96 = arith.mulf %91, %95 : vector<2x64xf32>
    %97 = vector.extract_strided_slice %10 {offsets = [0, 4, 0], sizes = [2, 1, 256], strides = [1, 1, 1]} : vector<2x8x256xf32> to vector<2x1x256xf32>
    %98 = vector.shape_cast %97 : vector<2x1x256xf32> to vector<2x256xf32>
    %cst_25 = arith.constant dense<0.000000e+00> : vector<2x256xf32>
    %99 = tpu.matmul %96, %0, %cst_25 {dimension_numbers = #tpu.dot_dimension_numbers<[1], [0], [0], [1], [0, 0, 1, 1], [], []>} : vector<2x64xf32>, vector<64x256xf32>, vector<2x256xf32> -> vector<2x256xf32>
    %100 = arith.addf %99, %98 : vector<2x256xf32>
    %101 = arith.negf %100 : vector<2x256xf32>
    %102 = math.exp %101 : vector<2x256xf32>
    %cst_26 = arith.constant 1.000000e+00 : f32
    %103 = vector.broadcast %cst_26 : f32 to vector<2x256xf32>
    %104 = arith.addf %103, %102 : vector<2x256xf32>
    %105 = arith.divf %103, %104 : vector<2x256xf32>
    %106 = vector.extract_strided_slice %105 {offsets = [0, 0], sizes = [2, 64], strides = [1, 1]} : vector<2x256xf32> to vector<2x64xf32>
    %107 = vector.extract_strided_slice %105 {offsets = [0, 64], sizes = [2, 64], strides = [1, 1]} : vector<2x256xf32> to vector<2x64xf32>
    %108 = vector.extract_strided_slice %105 {offsets = [0, 128], sizes = [2, 64], strides = [1, 1]} : vector<2x256xf32> to vector<2x64xf32>
    %cst_27 = arith.constant 2.000000e+00 : f32
    %109 = vector.broadcast %cst_27 : f32 to vector<2x64xf32>
    %110 = arith.mulf %109, %108 : vector<2x64xf32>
    %cst_28 = arith.constant 1.000000e+00 : f32
    %111 = vector.broadcast %cst_28 : f32 to vector<2x64xf32>
    %112 = arith.subf %110, %111 : vector<2x64xf32>
    %113 = vector.extract_strided_slice %105 {offsets = [0, 192], sizes = [2, 64], strides = [1, 1]} : vector<2x256xf32> to vector<2x64xf32>
    %114 = arith.mulf %107, %94 : vector<2x64xf32>
    %115 = arith.mulf %106, %112 : vector<2x64xf32>
    %116 = arith.addf %114, %115 : vector<2x64xf32>
    %117 = math.tanh %116 : vector<2x64xf32>
    %118 = arith.mulf %113, %117 : vector<2x64xf32>
    %119 = vector.extract_strided_slice %10 {offsets = [0, 5, 0], sizes = [2, 1, 256], strides = [1, 1, 1]} : vector<2x8x256xf32> to vector<2x1x256xf32>
    %120 = vector.shape_cast %119 : vector<2x1x256xf32> to vector<2x256xf32>
    %cst_29 = arith.constant dense<0.000000e+00> : vector<2x256xf32>
    %121 = tpu.matmul %118, %0, %cst_29 {dimension_numbers = #tpu.dot_dimension_numbers<[1], [0], [0], [1], [0, 0, 1, 1], [], []>} : vector<2x64xf32>, vector<64x256xf32>, vector<2x256xf32> -> vector<2x256xf32>
    %122 = arith.addf %121, %120 : vector<2x256xf32>
    %123 = arith.negf %122 : vector<2x256xf32>
    %124 = math.exp %123 : vector<2x256xf32>
    %cst_30 = arith.constant 1.000000e+00 : f32
    %125 = vector.broadcast %cst_30 : f32 to vector<2x256xf32>
    %126 = arith.addf %125, %124 : vector<2x256xf32>
    %127 = arith.divf %125, %126 : vector<2x256xf32>
    %128 = vector.extract_strided_slice %127 {offsets = [0, 0], sizes = [2, 64], strides = [1, 1]} : vector<2x256xf32> to vector<2x64xf32>
    %129 = vector.extract_strided_slice %127 {offsets = [0, 64], sizes = [2, 64], strides = [1, 1]} : vector<2x256xf32> to vector<2x64xf32>
    %130 = vector.extract_strided_slice %127 {offsets = [0, 128], sizes = [2, 64], strides = [1, 1]} : vector<2x256xf32> to vector<2x64xf32>
    %cst_31 = arith.constant 2.000000e+00 : f32
    %131 = vector.broadcast %cst_31 : f32 to vector<2x64xf32>
    %132 = arith.mulf %131, %130 : vector<2x64xf32>
    %cst_32 = arith.constant 1.000000e+00 : f32
    %133 = vector.broadcast %cst_32 : f32 to vector<2x64xf32>
    %134 = arith.subf %132, %133 : vector<2x64xf32>
    %135 = vector.extract_strided_slice %127 {offsets = [0, 192], sizes = [2, 64], strides = [1, 1]} : vector<2x256xf32> to vector<2x64xf32>
    %136 = arith.mulf %129, %116 : vector<2x64xf32>
    %137 = arith.mulf %128, %134 : vector<2x64xf32>
    %138 = arith.addf %136, %137 : vector<2x64xf32>
    %139 = math.tanh %138 : vector<2x64xf32>
    %140 = arith.mulf %135, %139 : vector<2x64xf32>
    %141 = vector.extract_strided_slice %10 {offsets = [0, 6, 0], sizes = [2, 1, 256], strides = [1, 1, 1]} : vector<2x8x256xf32> to vector<2x1x256xf32>
    %142 = vector.shape_cast %141 : vector<2x1x256xf32> to vector<2x256xf32>
    %cst_33 = arith.constant dense<0.000000e+00> : vector<2x256xf32>
    %143 = tpu.matmul %140, %0, %cst_33 {dimension_numbers = #tpu.dot_dimension_numbers<[1], [0], [0], [1], [0, 0, 1, 1], [], []>} : vector<2x64xf32>, vector<64x256xf32>, vector<2x256xf32> -> vector<2x256xf32>
    %144 = arith.addf %143, %142 : vector<2x256xf32>
    %145 = arith.negf %144 : vector<2x256xf32>
    %146 = math.exp %145 : vector<2x256xf32>
    %cst_34 = arith.constant 1.000000e+00 : f32
    %147 = vector.broadcast %cst_34 : f32 to vector<2x256xf32>
    %148 = arith.addf %147, %146 : vector<2x256xf32>
    %149 = arith.divf %147, %148 : vector<2x256xf32>
    %150 = vector.extract_strided_slice %149 {offsets = [0, 0], sizes = [2, 64], strides = [1, 1]} : vector<2x256xf32> to vector<2x64xf32>
    %151 = vector.extract_strided_slice %149 {offsets = [0, 64], sizes = [2, 64], strides = [1, 1]} : vector<2x256xf32> to vector<2x64xf32>
    %152 = vector.extract_strided_slice %149 {offsets = [0, 128], sizes = [2, 64], strides = [1, 1]} : vector<2x256xf32> to vector<2x64xf32>
    %cst_35 = arith.constant 2.000000e+00 : f32
    %153 = vector.broadcast %cst_35 : f32 to vector<2x64xf32>
    %154 = arith.mulf %153, %152 : vector<2x64xf32>
    %cst_36 = arith.constant 1.000000e+00 : f32
    %155 = vector.broadcast %cst_36 : f32 to vector<2x64xf32>
    %156 = arith.subf %154, %155 : vector<2x64xf32>
    %157 = vector.extract_strided_slice %149 {offsets = [0, 192], sizes = [2, 64], strides = [1, 1]} : vector<2x256xf32> to vector<2x64xf32>
    %158 = arith.mulf %151, %138 : vector<2x64xf32>
    %159 = arith.mulf %150, %156 : vector<2x64xf32>
    %160 = arith.addf %158, %159 : vector<2x64xf32>
    %161 = math.tanh %160 : vector<2x64xf32>
    %162 = arith.mulf %157, %161 : vector<2x64xf32>
    %163 = vector.extract_strided_slice %10 {offsets = [0, 7, 0], sizes = [2, 1, 256], strides = [1, 1, 1]} : vector<2x8x256xf32> to vector<2x1x256xf32>
    %164 = vector.shape_cast %163 : vector<2x1x256xf32> to vector<2x256xf32>
    %cst_37 = arith.constant dense<0.000000e+00> : vector<2x256xf32>
    %165 = tpu.matmul %162, %0, %cst_37 {dimension_numbers = #tpu.dot_dimension_numbers<[1], [0], [0], [1], [0, 0, 1, 1], [], []>} : vector<2x64xf32>, vector<64x256xf32>, vector<2x256xf32> -> vector<2x256xf32>
    %166 = arith.addf %165, %164 : vector<2x256xf32>
    %167 = arith.negf %166 : vector<2x256xf32>
    %168 = math.exp %167 : vector<2x256xf32>
    %cst_38 = arith.constant 1.000000e+00 : f32
    %169 = vector.broadcast %cst_38 : f32 to vector<2x256xf32>
    %170 = arith.addf %169, %168 : vector<2x256xf32>
    %171 = arith.divf %169, %170 : vector<2x256xf32>
    %172 = vector.extract_strided_slice %171 {offsets = [0, 0], sizes = [2, 64], strides = [1, 1]} : vector<2x256xf32> to vector<2x64xf32>
    %173 = vector.extract_strided_slice %171 {offsets = [0, 64], sizes = [2, 64], strides = [1, 1]} : vector<2x256xf32> to vector<2x64xf32>
    %174 = vector.extract_strided_slice %171 {offsets = [0, 128], sizes = [2, 64], strides = [1, 1]} : vector<2x256xf32> to vector<2x64xf32>
    %cst_39 = arith.constant 2.000000e+00 : f32
    %175 = vector.broadcast %cst_39 : f32 to vector<2x64xf32>
    %176 = arith.mulf %175, %174 : vector<2x64xf32>
    %cst_40 = arith.constant 1.000000e+00 : f32
    %177 = vector.broadcast %cst_40 : f32 to vector<2x64xf32>
    %178 = arith.subf %176, %177 : vector<2x64xf32>
    %179 = vector.extract_strided_slice %171 {offsets = [0, 192], sizes = [2, 64], strides = [1, 1]} : vector<2x256xf32> to vector<2x64xf32>
    %180 = arith.mulf %173, %160 : vector<2x64xf32>
    %181 = arith.mulf %172, %178 : vector<2x64xf32>
    %182 = arith.addf %180, %181 : vector<2x64xf32>
    %183 = math.tanh %182 : vector<2x64xf32>
    %184 = arith.mulf %179, %183 : vector<2x64xf32>
    %cst_41 = arith.constant dense<0.000000e+00> : vector<2x256xf32>
    %185 = tpu.matmul %184, %0, %cst_41 {dimension_numbers = #tpu.dot_dimension_numbers<[1], [0], [0], [1], [0, 0, 1, 1], [], []>} : vector<2x64xf32>, vector<64x256xf32>, vector<2x256xf32> -> vector<2x256xf32>
    %186 = arith.addf %185, %3 : vector<2x256xf32>
    %187 = arith.negf %186 : vector<2x256xf32>
    %188 = math.exp %187 : vector<2x256xf32>
    %cst_42 = arith.constant 1.000000e+00 : f32
    %189 = vector.broadcast %cst_42 : f32 to vector<2x256xf32>
    %190 = arith.addf %189, %188 : vector<2x256xf32>
    %191 = arith.divf %189, %190 : vector<2x256xf32>
    %192 = vector.extract_strided_slice %191 {offsets = [0, 0], sizes = [2, 64], strides = [1, 1]} : vector<2x256xf32> to vector<2x64xf32>
    %193 = vector.extract_strided_slice %191 {offsets = [0, 64], sizes = [2, 64], strides = [1, 1]} : vector<2x256xf32> to vector<2x64xf32>
    %194 = vector.extract_strided_slice %191 {offsets = [0, 128], sizes = [2, 64], strides = [1, 1]} : vector<2x256xf32> to vector<2x64xf32>
    %cst_43 = arith.constant 2.000000e+00 : f32
    %195 = vector.broadcast %cst_43 : f32 to vector<2x64xf32>
    %196 = arith.mulf %195, %194 : vector<2x64xf32>
    %cst_44 = arith.constant 1.000000e+00 : f32
    %197 = vector.broadcast %cst_44 : f32 to vector<2x64xf32>
    %198 = arith.subf %196, %197 : vector<2x64xf32>
    %199 = vector.extract_strided_slice %191 {offsets = [0, 192], sizes = [2, 64], strides = [1, 1]} : vector<2x256xf32> to vector<2x64xf32>
    %200 = arith.mulf %193, %182 : vector<2x64xf32>
    %201 = arith.mulf %192, %198 : vector<2x64xf32>
    %202 = arith.addf %200, %201 : vector<2x64xf32>
    %203 = math.tanh %202 : vector<2x64xf32>
    %204 = arith.mulf %199, %203 : vector<2x64xf32>
    %c0_45 = arith.constant 0 : index
    %c0_46 = arith.constant 0 : index
    %205 = vector.load %arg4[%c0_45, %c0_46] : memref<64x3xf32, #tpu.memory_space<vmem>>, vector<64x3xf32>
    %cst_47 = arith.constant dense<0.000000e+00> : vector<2x3xf32>
    %206 = tpu.matmul %204, %205, %cst_47 {dimension_numbers = #tpu.dot_dimension_numbers<[1], [0], [0], [1], [0, 0, 1, 1], [], []>} : vector<2x64xf32>, vector<64x3xf32>, vector<2x3xf32> -> vector<2x3xf32>
    %c0_48 = arith.constant 0 : index
    %c0_49 = arith.constant 0 : index
    %207 = vector.load %arg5[%c0_48, %c0_49] : memref<1x3xf32, #tpu.memory_space<vmem>>, vector<1x3xf32>
    %208 = vector.broadcast %207 : vector<1x3xf32> to vector<2x3xf32>
    %209 = arith.addf %206, %208 : vector<2x3xf32>
    %c0_50 = arith.constant 0 : index
    %c0_51 = arith.constant 0 : index
    %210 = vector.load %arg6[%c0_50, %c0_51] : memref<2x3xf32, #tpu.memory_space<vmem>>, vector<2x3xf32>
    tpu.vector_store %arg6[%c0_50, %c0_51], %209 {strides = array<i32>} : memref<2x3xf32, #tpu.memory_space<vmem>>, vector<2x3xf32>,
    return
  }
}

</mosaic_0001>

<bundles_post_ra>
// kernel: tpu_custom_call.1
= control target key start
LH: loop header
LB: loop body
LE: loop exit
PB: predicated region body
PF: predicated region fallthrough
CT: control target
= control target key end

     0   :  { %11 = vsyncpa [#allocation3], 0  ;;  %s1852_s0 = inlined_call_operand.vmem [shape: f32[16,2], index: 0, kind: input, shape index: {}]   ;;  %s1853_s1 = inlined_call_operand.vmem [shape: f32[2,256], index: 1, kind: input, shape index: {}]   ;;  %s1854_s2 = inlined_call_operand.vmem [shape: f32[1,256], index: 2, kind: input, shape index: {}]   ;;  %s1855_s3 = inlined_call_operand.hbm [shape: f32[64,256], index: 3, kind: input, shape index: {}]   ;;  %s1856_s4 = inlined_call_operand.vmem [shape: f32[64,3], index: 4, kind: input, shape index: {}]   ;;  %s1857_s5 = inlined_call_operand.vmem [shape: f32[1,3], index: 5, kind: input, shape index: {}]   ;;  %s1858_s6 = inlined_call_operand.hbm [shape: f32[2,3], index: 6, kind: output, shape index: {}]  }
   0x1   :  { %12 = vsyncpa [#allocation4], 0  ;;  %s1554_s21 = smov [#allocation2]   ;;  %s1506_s25 = scalar_lea.hbm %s1855_s3, 2048 }
   0x2   :  { %s24_s22 = sshll.u32 %s1554_s21, 4  ;;  %p1507_p0 = scmp.ne.s32.totalorder %s1855_s3, %s1506_s25  ;;  %s25_s22 = int_to_ptr.vmem [resolvable:$true] %s24_s22 }
   0x3   :  { %p1510_p1 = scmp.lt.u32.totalorder %s1506_s25, %s1855_s3 }
   0x5   :  { %p1512_p2 = pnand %p1510_p1, %p1507_p0 }
   0x7   :  { %1515 = shalt.err (!%p1512_p2)
}
   0x8   :  { %s1516_s30 = scalar_lea.vmem %s25_s22, 2048  ;;  %p1521_p4 = scmp.lt.s32.totalorder %s25_s22, %s25_s22 }
   0x9   :  { %p1517_p3 = scmp.ne.s32.totalorder %s25_s22, %s1516_s30  ;;  %p1522_p5 = scmp.lt.s32.totalorder %s1516_s30, %s1516_s30 }
   0xb   :  { %p1523_p6 = por %p1522_p5, %p1521_p4 }
   0xd   :  { %p1524_p7 = pnand %p1523_p6, %p1517_p3 }
   0xf   :  { %1527 = shalt.err (!%p1524_p7)
}
  0x10   :  { %s1555_s7 = smov 256   ;;  %s1556_s8 = smov 16  }
  0x11   :  { %30 = dma.hbm_to_vmem [thread:$0]  %s1855_s3, 2048, %s25_s22, [#allocation3], %s1555_s7, %s1555_s7, %s1556_s8  }
  0x12   :  { %1550 = dma.done.wait [#allocation3], 2048  }
  0x13   :  { %1551 = vsyncadd [#allocation3], 4294965248  ;;  %v1557_v0 = vmov 0.0   ;;  %vm85_vm0 = vcmask 1041408   ;;  %v66_v3 = vld [vmem:[%s1852_s0] sm:$0xff]  ;;  %vm78_vm1 = vcmask 15360   ;;  %v56_v5 = vlaneseq }
  0x14   :  { %154 = vmatprep.mubr.f32.mxu0 %v1557_v0  ;;  %303 = vmatprep.mubr.f32.mxu1 %v1557_v0  ;;  %v1185_v1 = vld.sshfl [vmem:[%s1853_s1] sm:$0x33 pattern:$0x76325410]  ;;  %v67_v4 = vld [vmem:[%s1852_s0 + $0x8] sm:$0xff]  ;;  %vm212_vm2 = vcmask 1041409  }
  0x15   :  { %v77_v2 = vcombine.high %v1185_v1, %v1185_v1  ;;  %v57_v6 = vshrl.u32 %v56_v5, 7  ;;  %v54_v8 = vld [vmem:[%s1854_s2] sm:$0x3]  ;;  %s1558_s0 = smov 64   ;;  %vm217_vm3 = vcmask 261120   ;;  %vm235_vm4 = vcmask 523264  }
  0x16   :  { %vm1560_vm5 = vmmov 0   ;;  %vm1168_vm6 = vcmask 17408  }
  0x17   :  { %1186 = vmatprep.subr.msk.mxu0 %vm85_vm0, %v77_v2  ;;  %v58_v7 = vsub.s32 0, %v57_v6  ;;  %v62_v9 = vsub.s32 1, %v57_v6 }
  0x18   :  { %1187 = vmatpush1.msk.msra.mxu0 %vm85_vm0, %v1185_v1 }
  0x19   :  { %1188 = vmatmul.mubr.msk.f32.vlgmr.msra.gmra.mrb[0].mxu0 %vm78_vm1, %v66_v3  ;;  %v1625_v10 = vrot.slane %v54_v8, %v58_v7  ;;  %v1627_v11 = vrot.slane %v54_v8, %v62_v9 }
  0x1a   :  { %160 = vmatprep.mubr.f32.mxu0 %v1557_v0 }
  0x1d   :  { %1189 = vmatmul.mubr.msk.f32.gmra.mrb[2].mxu0 %vm78_vm1, %v67_v4 }
  0x1e   :  { %414 = vmatprep.mubr.f32.mxu0 %v1557_v0 }
  0xec   :  { %v156_v12 = vpop.f32.mrb[0].mxu0 }
  0xed   :  { %v157_v13 = vadd.f32 %v156_v12, %v1625_v10  ;;  %v158_v14 = vpop.f32.mrb[1].mxu0 }
  0xee   :  { %v159_v15 = vadd.f32 %v158_v14, %v1627_v11 }
  0xef   :  { %v1190_v16 = vmul.f32 -1.442695, %v157_v13  ;;  %v229_v17 = vrot.slane %v157_v13, 1  ;;  %v340_v18 = vrot.slane %v157_v13, 2  ;;  %v447_v19 = vrot.slane %v157_v13, 3 }
  0xf0   :  { %v1191_v20 = vmul.f32 -1.442695, %v159_v15  ;;  %v162_v21 = vpop.f32.mrb[2].mxu0  ;;  %v231_v22 = vrot.slane %v159_v15, 1  ;;  %v343_v23 = vrot.slane %v159_v15, 2  ;;  %v450_v24 = vrot.slane %v159_v15, 3 }
  0xf1   :  { %1406 = vpow2.f32 %v1190_v16  ;;  %v163_v25 = vadd.f32 %v162_v21, %v1625_v10  ;;  %v164_v26 = vpop.f32.mrb[3].mxu0  ;;  %v554_v27 = vrot.slane %v157_v13, 4  ;;  %v557_v28 = vrot.slane %v159_v15, 4 }
  0xf2   :  { %1408 = vpow2.f32 %v1191_v20  ;;  %v165_v29 = vadd.f32 %v164_v26, %v1627_v11  ;;  %v661_v30 = vrot.slane %v157_v13, 5  ;;  %v664_v31 = vrot.slane %v159_v15, 5 }
  0xf3   :  { %v1192_v32 = vmul.f32 -1.442695, %v163_v25  ;;  %v1634_v33 = vsel %vm212_vm2, %v163_v25, %v229_v17  ;;  %v341_v34 = vrot.slane %v163_v25, 1  ;;  %v448_v35 = vrot.slane %v163_v25, 2 }
  0xf4   :  { %v1193_v36 = vmul.f32 -1.442695, %v165_v29  ;;  %v1637_v37 = vsel %vm212_vm2, %v165_v29, %v231_v22  ;;  %v344_v38 = vrot.slane %v165_v29, 1  ;;  %v451_v39 = vrot.slane %v165_v29, 2 }
  0xf5   :  { %1410 = vpow2.f32 %v1192_v32  ;;  %v1640_v40 = vsel %vm212_vm2, %v341_v34, %v340_v18  ;;  %v1643_v41 = vsel %vm212_vm2, %v448_v35, %v447_v19  ;;  %v555_v42 = vrot.slane %v163_v25, 3  ;;  %v42_v34 = vld [vmem:[#allocation2 + $0x20] sm:$0xff]  ;;  %v44_v35 = vld [vmem:[#allocation2 + $0x30] sm:$0xff] }
  0xf6   :  { %1412 = vpow2.f32 %v1193_v36  ;;  %v1646_v43 = vsel %vm212_vm2, %v344_v38, %v343_v23  ;;  %v1649_v44 = vsel %vm212_vm2, %v451_v39, %v450_v24  ;;  %v558_v45 = vrot.slane %v165_v29, 3  ;;  %v39_v23 = vld [vmem:[#allocation2 + $0x8] sm:$0xff]  ;;  %v41_v24 = vld [vmem:[#allocation2 + $0x18] sm:$0xff] }
  0xf7   :  { %v1652_v46 = vsel %vm212_vm2, %v555_v42, %v554_v27  ;;  %v662_v47 = vrot.slane %v163_v25, 4  ;;  %v665_v48 = vrot.slane %v165_v29, 4  ;;  %v768_v49 = vrot.slane %v157_v13, 6  ;;  %v47_v36 = vld [vmem:[#allocation2 + $0x48] sm:$0xff]  ;;  %v49_v38 = vld [vmem:[#allocation2 + $0x58] sm:$0xff] }
  0xf8   :  { %v1655_v50 = vsel %vm212_vm2, %v558_v45, %v557_v28  ;;  %v769_v51 = vrot.slane %v163_v25, 5  ;;  %v771_v52 = vrot.slane %v159_v15, 6  ;;  %v772_v53 = vrot.slane %v165_v29, 5  ;;  %v40_v28 = vld [vmem:[#allocation2 + $0x10] sm:$0xff] }
  0xf9   :  { %v1658_v54 = vsel %vm212_vm2, %v662_v47, %v661_v30  ;;  %v1661_v55 = vsel %vm212_vm2, %v665_v48, %v664_v31  ;;  %v875_v56 = vrot.slane %v157_v13, 7  ;;  %v876_v57 = vrot.slane %v163_v25, 6  ;;  %v38_v25 = vld [vmem:[#allocation2] sm:$0xff]  ;;  %v45_v30 = vld [vmem:[#allocation2 + $0x38] sm:$0xff]  ;;  %v48_v48 = vld [vmem:[#allocation2 + $0x50] sm:$0xff] }
  0xfa   :  { %v1664_v58 = vsel %vm212_vm2, %v769_v51, %v768_v49  ;;  %v1667_v59 = vsel %vm212_vm2, %v772_v53, %v771_v52  ;;  %v878_v60 = vrot.slane %v159_v15, 7  ;;  %v879_v61 = vrot.slane %v165_v29, 6  ;;  %v43_v29 = vld [vmem:[#allocation2 + $0x28] sm:$0xff]  ;;  %v46_v47 = vld [vmem:[#allocation2 + $0x40] sm:$0xff]  ;;  %v53_v51 = vld [vmem:[#allocation2 + $0x78] sm:$0xff] }
  0xfb   :  { %v1407_v62 = vpop.eup %1406  ;;  %v1670_v63 = vsel %vm212_vm2, %v876_v57, %v875_v56  ;;  %v1679_v27 = vpack.c.bf16 %v41_v24, %v39_v23  ;;  %v1682_v31 = vpack.c.bf16 %v40_v28, %v38_v25  ;;  %v1684_v32 = vpack.c.bf16 %v45_v30, %v43_v29  ;;  %v51_v49 = vld [vmem:[#allocation2 + $0x68] sm:$0xff]  ;;  %v50_v56 = vld [vmem:[#allocation2 + $0x60] sm:$0xff]  ;;  %v52_v57 = vld [vmem:[#allocation2 + $0x70] sm:$0xff] }
  0xfc   :  { %v1409_v1 = vpop.eup %1408  ;;  %v1673_v2 = vsel %vm212_vm2, %v879_v61, %v878_v60  ;;  %v179_v8 = vadd.f32 1.0, %v1407_v62  ;;  %v1689_v39 = vpack.c.bf16 %v44_v35, %v42_v34  ;;  %v1693_v45 = vpack.c.bf16 %v49_v38, %v47_v36 }
  0xfd   :  { %v180_v3 = vadd.f32 1.0, %v1409_v1  ;;  %1259 = vmatprep.subr.bf16.mxu1 %v1679_v27  ;;  %1275 = vmatprep.subr.bf16.mxu0 %v1679_v27  ;;  %v1698_v52 = vpack.c.bf16 %v48_v48, %v46_v47  ;;  %v1702_v53 = vpack.c.bf16 %v53_v51, %v51_v49  ;;  %v1706_v60 = vpack.c.bf16 %v52_v57, %v50_v56 }
  0xfe   :  { %1261 = vmatpush1.bf16.msra.mxu1 %v1682_v31  ;;  %1277 = vmatpush1.bf16.msra.mxu0 %v1682_v31 }
  0xff   :  { %v1411_v4 = vpop.eup %1410  ;;  %1414 = vrcp.f32 %v180_v3  ;;  %1263 = vmatprep.subr.bf16.mxu1 %v1684_v32  ;;  %1279 = vmatprep.subr.bf16.mxu0 %v1684_v32 }
 0x100   :  { %v1413_v5 = vpop.eup %1412  ;;  %v181_v7 = vadd.f32 1.0, %v1411_v4 }
 0x101   :  { %v182_v6 = vadd.f32 1.0, %v1413_v5 }
 0x102   :  { %1265 = vmatpush1.bf16.msra.mxu1 %v1689_v39  ;;  %1281 = vmatpush1.bf16.msra.mxu0 %v1689_v39 }
 0x103   :  { %1416 = vrcp.f32 %v182_v6  ;;  %1267 = vmatprep.subr.bf16.mxu1 %v1693_v45  ;;  %1283 = vmatprep.subr.bf16.mxu0 %v1693_v45 }
 0x104   :  { %1418 = vrcp.f32 %v181_v7 }
 0x105   :  { %1420 = vrcp.f32 %v179_v8 }
 0x106   :  { %1269 = vmatpush1.bf16.msra.mxu1 %v1698_v52  ;;  %1285 = vmatpush1.bf16.msra.mxu0 %v1698_v52 }
 0x107   :  { %1271 = vmatprep.subr.bf16.mxu1 %v1702_v53  ;;  %1287 = vmatprep.subr.bf16.mxu0 %v1702_v53 }
 0x109   :  { %v1675_v9 = vpop.eup %1414 }
 0x10a   :  { %v191_v12 = vmul.f32 2.0, %v1675_v9  ;;  %1273 = vmatpush1.bf16.msra.mxu1 %v1706_v60  ;;  %1289 = vmatpush1.bf16.msra.mxu0 %v1706_v60 }
 0x10b   :  { %1291 = vmatprep.subr.bf16.mxu1 %v1679_v27  ;;  %1307 = vmatprep.subr.bf16.mxu0 %v1679_v27 }
 0x10c   :  { %v1194_v16 = vadd.f32 -1.0, %v191_v12 }
 0x10d   :  { %v1417_v13 = vpop.eup %1416 }
 0x10e   :  { %v192_v14 = vmul.f32 2.0, %v1417_v13  ;;  %v1419_v17 = vpop.eup %1418 }
 0x10f   :  { %v1421_v19 = vpop.eup %1420 }
 0x110   :  { %v1195_v15 = vadd.f32 -1.0, %v192_v14  ;;  %v195_v20 = vmul.f32 %v1421_v19, %v1194_v16 }
 0x112   :  { %v196_v18 = vmul.f32 %v1419_v17, %v1195_v15 }
 0x114   :  { %1422 = vtanh.f32 %v196_v18  ;;  %v221_v21 = vrot.slane %v196_v18, 7 }
 0x115   :  { %1424 = vtanh.f32 %v195_v20 }
 0x116   :  { %v222_v22 = vsel %vm212_vm2, %v221_v21, %v195_v20 }
 0x117   :  { %v224_v6 = vsel %vm217_vm3, %v222_v22, 0.0 }
 0x11e   :  { %v1423_v26 = vpop.eup %1422 }
 0x11f   :  { %203 = vrot.lane.b32.xlu0 %v1423_v26, %s1558_s0  ;;  %v1425_v42 = vpop.eup %1424 }
 0x123   :  { %201 = vrot.lane.b32.xlu0 %v1425_v42, %s1558_s0 }
 0x191   :  { %v204_v61 = vpop.permute.xlu0 %203 }
 0x192   :  { %v208_v62 = vmul.f32 %v1417_v13, %v204_v61 }
 0x194   :  { %v211_v3 = vrot.slane %v208_v62, 7 }
 0x195   :  { %v202_v1 = vpop.permute.xlu0 %201 }
 0x196   :  { %v207_v4 = vmul.f32 %v1675_v9, %v202_v1 }
 0x198   :  { %v213_v5 = vsel %vm212_vm2, %v211_v3, %v207_v4 }
 0x199   :  { %214 = vrot.lane.b32.xlu1 %v213_v5, %s1558_s0 }
 0x19d   :  { %325 = vrot.lane.b32.xlu1 %v224_v6, %s1558_s0 }
 0x20b   :  { %v215_v7 = vpop.permute.xlu1 %214 }
 0x20c   :  { %v218_v8 = vsel %vm217_vm3, %v215_v7, 0.0 }
 0x20d   :  { %1196 = vmatmul.mubr.msk.f32.vlgmr.msra.gmra.mrb[0].mxu1 %vm235_vm4, %v218_v8 }
 0x20e   :  { %1293 = vmatpush1.bf16.msra.mxu1 %v1682_v31  ;;  %521 = vmatprep.mubr.f32.mxu1 %v1557_v0 }
 0x20f   :  { %1295 = vmatprep.subr.bf16.mxu1 %v1684_v32 }
 0x212   :  { %1297 = vmatpush1.bf16.msra.mxu1 %v1689_v39 }
 0x213   :  { %1299 = vmatprep.subr.bf16.mxu1 %v1693_v45 }
 0x216   :  { %1301 = vmatpush1.bf16.msra.mxu1 %v1698_v52 }
 0x217   :  { %1303 = vmatprep.subr.bf16.mxu1 %v1702_v53 }
 0x21a   :  { %1305 = vmatpush1.bf16.msra.mxu1 %v1706_v60 }
 0x21b   :  { %1323 = vmatprep.subr.bf16.mxu1 %v1679_v27 }
 0x2e0   :  { %v305_v9 = vpop.f32.mrb[0].mxu1 }
 0x2e1   :  { %v306_v12 = vadd.f32 %v305_v9, %v1634_v33  ;;  %v307_v13 = vpop.f32.mrb[1].mxu1  ;;  %v326_v33 = vpop.permute.xlu1 %325 }
 0x2e2   :  { %v308_v14 = vadd.f32 %v307_v13, %v1637_v37 }
 0x2e3   :  { %v1197_v15 = vmul.f32 -1.442695, %v306_v12 }
 0x2e4   :  { %v1198_v16 = vmul.f32 -1.442695, %v308_v14 }
 0x2e5   :  { %1426 = vpow2.f32 %v1197_v15 }
 0x2e6   :  { %1428 = vpow2.f32 %v1198_v16 }
 0x2ef   :  { %v1427_v17 = vpop.eup %1426 }
 0x2f0   :  { %v1429_v18 = vpop.eup %1428  ;;  %v316_v20 = vadd.f32 1.0, %v1427_v17 }
 0x2f1   :  { %v317_v19 = vadd.f32 1.0, %v1429_v18 }
 0x2f3   :  { %1430 = vrcp.f32 %v317_v19 }
 0x2f4   :  { %1432 = vrcp.f32 %v316_v20 }
 0x2fd   :  { %v1431_v21 = vpop.eup %1430 }
 0x2fe   :  { %v322_v22 = vmul.f32 2.0, %v1431_v21  ;;  %v1433_v24 = vpop.eup %1432 }
 0x2ff   :  { %v328_v26 = vmul.f32 %v1433_v24, %v326_v33 }
 0x300   :  { %v1199_v23 = vadd.f32 -1.0, %v322_v22 }
 0x302   :  { %v329_v25 = vmul.f32 %v1433_v24, %v1199_v23 }
 0x304   :  { %331 = vrot.lane.b32.xlu0 %v329_v25, %s1558_s0 }
 0x376   :  { %v332_v37 = vpop.permute.xlu0 %331 }
 0x377   :  { %v334_v28 = vadd.f32 %v332_v37, %v328_v26 }
 0x379   :  { %1434 = vtanh.f32 %v334_v28 }
 0x383   :  { %v1435_v29 = vpop.eup %1434 }
 0x384   :  { %v336_v30 = vmul.f32 %v1435_v29, %v1431_v21 }
 0x386   :  { %338 = vrot.lane.b32.xlu1 %v336_v30, %s1558_s0 }
 0x3f8   :  { %v339_v34 = vpop.permute.xlu1 %338 }
 0x3f9   :  { %1200 = vmatmul.mubr.msk.f32.vlgmr.msra.gmra.mrb[4].mxu0 %vm235_vm4, %v339_v34 }
 0x3fa   :  { %1309 = vmatpush1.bf16.msra.mxu0 %v1682_v31  ;;  %628 = vmatprep.mubr.f32.mxu0 %v1557_v0 }
 0x3fb   :  { %1311 = vmatprep.subr.bf16.mxu0 %v1684_v32 }
 0x3fe   :  { %1313 = vmatpush1.bf16.msra.mxu0 %v1689_v39 }
 0x3ff   :  { %1315 = vmatprep.subr.bf16.mxu0 %v1693_v45 }
 0x402   :  { %1317 = vmatpush1.bf16.msra.mxu0 %v1698_v52 }
 0x403   :  { %1319 = vmatprep.subr.bf16.mxu0 %v1702_v53 }
 0x406   :  { %1321 = vmatpush1.bf16.msra.mxu0 %v1706_v60 }
 0x407   :  { %1339 = vmatprep.subr.bf16.mxu0 %v1679_v27 }
 0x4cc   :  { %v416_v35 = vpop.f32.mrb[4].mxu0 }
 0x4cd   :  { %v417_v36 = vadd.f32 %v416_v35, %v1640_v40  ;;  %v418_v38 = vpop.f32.mrb[5].mxu0 }
 0x4ce   :  { %v419_v42 = vadd.f32 %v418_v38, %v1646_v43 }
 0x4cf   :  { %v1201_v47 = vmul.f32 -1.442695, %v417_v36 }
 0x4d0   :  { %v1202_v48 = vmul.f32 -1.442695, %v419_v42 }
 0x4d1   :  { %1436 = vpow2.f32 %v1201_v47 }
 0x4d2   :  { %1438 = vpow2.f32 %v1202_v48 }
 0x4db   :  { %v1437_v49 = vpop.eup %1436 }
 0x4dc   :  { %v1439_v51 = vpop.eup %1438  ;;  %v427_v57 = vadd.f32 1.0, %v1437_v49 }
 0x4dd   :  { %v428_v56 = vadd.f32 1.0, %v1439_v51 }
 0x4df   :  { %1440 = vrcp.f32 %v428_v56 }
 0x4e0   :  { %1442 = vrcp.f32 %v427_v57 }
 0x4e9   :  { %v1441_v61 = vpop.eup %1440 }
 0x4ea   :  { %v433_v62 = vmul.f32 2.0, %v1441_v61  ;;  %v1443_v3 = vpop.eup %1442 }
 0x4eb   :  { %v435_v40 = vmul.f32 %v1443_v3, %v334_v28 }
 0x4ec   :  { %v1203_v1 = vadd.f32 -1.0, %v433_v62 }
 0x4ee   :  { %v436_v4 = vmul.f32 %v1443_v3, %v1203_v1 }
 0x4f0   :  { %438 = vrot.lane.b32.xlu0 %v436_v4, %s1558_s0 }
 0x562   :  { %v439_v5 = vpop.permute.xlu0 %438 }
 0x563   :  { %v441_v43 = vadd.f32 %v439_v5, %v435_v40 }
 0x565   :  { %1444 = vtanh.f32 %v441_v43 }
 0x56f   :  { %v1445_v6 = vpop.eup %1444 }
 0x570   :  { %v443_v7 = vmul.f32 %v1445_v6, %v1441_v61 }
 0x572   :  { %445 = vrot.lane.b32.xlu1 %v443_v7, %s1558_s0 }
 0x5e4   :  { %v446_v8 = vpop.permute.xlu1 %445 }
 0x5e5   :  { %1204 = vmatmul.mubr.msk.f32.vlgmr.msra.gmra.mrb[2].mxu1 %vm235_vm4, %v446_v8 }
 0x5e6   :  { %1325 = vmatpush1.bf16.msra.mxu1 %v1682_v31  ;;  %735 = vmatprep.mubr.f32.mxu1 %v1557_v0 }
 0x5e7   :  { %1327 = vmatprep.subr.bf16.mxu1 %v1684_v32 }
 0x5ea   :  { %1329 = vmatpush1.bf16.msra.mxu1 %v1689_v39 }
 0x5eb   :  { %1331 = vmatprep.subr.bf16.mxu1 %v1693_v45 }
 0x5ee   :  { %1333 = vmatpush1.bf16.msra.mxu1 %v1698_v52 }
 0x5ef   :  { %1335 = vmatprep.subr.bf16.mxu1 %v1702_v53 }
 0x5f2   :  { %1337 = vmatpush1.bf16.msra.mxu1 %v1706_v60 }
 0x5f3   :  { %1355 = vmatprep.subr.bf16.mxu1 %v1679_v27 }
 0x6b8   :  { %v523_v9 = vpop.f32.mrb[2].mxu1 }
 0x6b9   :  { %v524_v12 = vadd.f32 %v523_v9, %v1643_v41  ;;  %v525_v13 = vpop.f32.mrb[3].mxu1 }
 0x6ba   :  { %v526_v14 = vadd.f32 %v525_v13, %v1649_v44 }
 0x6bb   :  { %v1205_v15 = vmul.f32 -1.442695, %v524_v12 }
 0x6bc   :  { %v1206_v16 = vmul.f32 -1.442695, %v526_v14 }
 0x6bd   :  { %1446 = vpow2.f32 %v1205_v15 }
 0x6be   :  { %1448 = vpow2.f32 %v1206_v16 }
 0x6c7   :  { %v1447_v17 = vpop.eup %1446 }
 0x6c8   :  { %v1449_v18 = vpop.eup %1448  ;;  %v534_v20 = vadd.f32 1.0, %v1447_v17 }
 0x6c9   :  { %v535_v19 = vadd.f32 1.0, %v1449_v18 }
 0x6cb   :  { %1450 = vrcp.f32 %v535_v19 }
 0x6cc   :  { %1452 = vrcp.f32 %v534_v20 }
 0x6d5   :  { %v1451_v21 = vpop.eup %1450 }
 0x6d6   :  { %v540_v22 = vmul.f32 2.0, %v1451_v21  ;;  %v1453_v24 = vpop.eup %1452 }
 0x6d7   :  { %v542_v41 = vmul.f32 %v1453_v24, %v441_v43 }
 0x6d8   :  { %v1207_v23 = vadd.f32 -1.0, %v540_v22 }
 0x6da   :  { %v543_v25 = vmul.f32 %v1453_v24, %v1207_v23 }
 0x6dc   :  { %545 = vrot.lane.b32.xlu0 %v543_v25, %s1558_s0 }
 0x74e   :  { %v546_v33 = vpop.permute.xlu0 %545 }
 0x74f   :  { %v548_v44 = vadd.f32 %v546_v33, %v542_v41 }
 0x751   :  { %1454 = vtanh.f32 %v548_v44 }
 0x75b   :  { %v1455_v26 = vpop.eup %1454 }
 0x75c   :  { %v550_v37 = vmul.f32 %v1455_v26, %v1451_v21 }
 0x75e   :  { %552 = vrot.lane.b32.xlu1 %v550_v37, %s1558_s0 }
 0x7d0   :  { %v553_v28 = vpop.permute.xlu1 %552 }
 0x7d1   :  { %1208 = vmatmul.mubr.msk.f32.vlgmr.msra.gmra.mrb[6].mxu0 %vm235_vm4, %v553_v28 }
 0x7d2   :  { %1341 = vmatpush1.bf16.msra.mxu0 %v1682_v31  ;;  %842 = vmatprep.mubr.f32.mxu0 %v1557_v0 }
 0x7d3   :  { %1343 = vmatprep.subr.bf16.mxu0 %v1684_v32 }
 0x7d6   :  { %1345 = vmatpush1.bf16.msra.mxu0 %v1689_v39 }
 0x7d7   :  { %1347 = vmatprep.subr.bf16.mxu0 %v1693_v45 }
 0x7da   :  { %1349 = vmatpush1.bf16.msra.mxu0 %v1698_v52 }
 0x7db   :  { %1351 = vmatprep.subr.bf16.mxu0 %v1702_v53 }
 0x7de   :  { %1353 = vmatpush1.bf16.msra.mxu0 %v1706_v60 }
 0x7df   :  { %1371 = vmatprep.subr.bf16.mxu0 %v1679_v27 }
 0x8a4   :  { %v630_v29 = vpop.f32.mrb[6].mxu0 }
 0x8a5   :  { %v631_v30 = vadd.f32 %v630_v29, %v1652_v46  ;;  %v632_v34 = vpop.f32.mrb[7].mxu0 }
 0x8a6   :  { %v633_v35 = vadd.f32 %v632_v34, %v1655_v50 }
 0x8a7   :  { %v1209_v36 = vmul.f32 -1.442695, %v631_v30 }
 0x8a8   :  { %v1210_v38 = vmul.f32 -1.442695, %v633_v35 }
 0x8a9   :  { %1456 = vpow2.f32 %v1209_v36 }
 0x8aa   :  { %1458 = vpow2.f32 %v1210_v38 }
 0x8b3   :  { %v1457_v42 = vpop.eup %1456 }
 0x8b4   :  { %v1459_v47 = vpop.eup %1458  ;;  %v641_v49 = vadd.f32 1.0, %v1457_v42 }
 0x8b5   :  { %v642_v48 = vadd.f32 1.0, %v1459_v47 }
 0x8b7   :  { %1460 = vrcp.f32 %v642_v48 }
 0x8b8   :  { %1462 = vrcp.f32 %v641_v49 }
 0x8c1   :  { %v1461_v51 = vpop.eup %1460 }
 0x8c2   :  { %v647_v56 = vmul.f32 2.0, %v1461_v51  ;;  %v1463_v27 = vpop.eup %1462 }
 0x8c3   :  { %v649_v46 = vmul.f32 %v1463_v27, %v548_v44 }
 0x8c4   :  { %v1211_v57 = vadd.f32 -1.0, %v647_v56 }
 0x8c6   :  { %v650_v61 = vmul.f32 %v1463_v27, %v1211_v57 }
 0x8c8   :  { %652 = vrot.lane.b32.xlu0 %v650_v61, %s1558_s0 }
 0x93a   :  { %v653_v62 = vpop.permute.xlu0 %652 }
 0x93b   :  { %v655_v50 = vadd.f32 %v653_v62, %v649_v46 }
 0x93d   :  { %1464 = vtanh.f32 %v655_v50 }
 0x947   :  { %v1465_v1 = vpop.eup %1464 }
 0x948   :  { %v657_v3 = vmul.f32 %v1465_v1, %v1461_v51 }
 0x94a   :  { %659 = vrot.lane.b32.xlu1 %v657_v3, %s1558_s0 }
 0x9bc   :  { %v660_v4 = vpop.permute.xlu1 %659 }
 0x9bd   :  { %1212 = vmatmul.mubr.msk.f32.vlgmr.msra.gmra.mrb[4].mxu1 %vm235_vm4, %v660_v4 }
 0x9be   :  { %1357 = vmatpush1.bf16.msra.mxu1 %v1682_v31  ;;  %949 = vmatprep.mubr.f32.mxu1 %v1557_v0 }
 0x9bf   :  { %1359 = vmatprep.subr.bf16.mxu1 %v1684_v32 }
 0x9c2   :  { %1361 = vmatpush1.bf16.msra.mxu1 %v1689_v39 }
 0x9c3   :  { %1363 = vmatprep.subr.bf16.mxu1 %v1693_v45 }
 0x9c6   :  { %1365 = vmatpush1.bf16.msra.mxu1 %v1698_v52 }
 0x9c7   :  { %1367 = vmatprep.subr.bf16.mxu1 %v1702_v53 }
 0x9ca   :  { %1369 = vmatpush1.bf16.msra.mxu1 %v1706_v60 }
 0xa90   :  { %v737_v40 = vpop.f32.mrb[4].mxu1 }
 0xa91   :  { %v738_v5 = vadd.f32 %v737_v40, %v1658_v54  ;;  %v739_v43 = vpop.f32.mrb[5].mxu1 }
 0xa92   :  { %v740_v6 = vadd.f32 %v739_v43, %v1661_v55 }
 0xa93   :  { %v1213_v7 = vmul.f32 -1.442695, %v738_v5 }
 0xa94   :  { %v1214_v8 = vmul.f32 -1.442695, %v740_v6 }
 0xa95   :  { %1466 = vpow2.f32 %v1213_v7 }
 0xa96   :  { %1468 = vpow2.f32 %v1214_v8 }
 0xa9f   :  { %v1467_v9 = vpop.eup %1466 }
 0xaa0   :  { %v1469_v12 = vpop.eup %1468  ;;  %v748_v14 = vadd.f32 1.0, %v1467_v9 }
 0xaa1   :  { %v749_v13 = vadd.f32 1.0, %v1469_v12 }
 0xaa3   :  { %1470 = vrcp.f32 %v749_v13 }
 0xaa4   :  { %1472 = vrcp.f32 %v748_v14 }
 0xaad   :  { %v1471_v15 = vpop.eup %1470 }
 0xaae   :  { %v754_v16 = vmul.f32 2.0, %v1471_v15  ;;  %v1473_v18 = vpop.eup %1472 }
 0xaaf   :  { %v756_v54 = vmul.f32 %v1473_v18, %v655_v50 }
 0xab0   :  { %v1215_v17 = vadd.f32 -1.0, %v754_v16 }
 0xab2   :  { %v757_v19 = vmul.f32 %v1473_v18, %v1215_v17 }
 0xab4   :  { %759 = vrot.lane.b32.xlu0 %v757_v19, %s1558_s0 }
 0xb26   :  { %v760_v20 = vpop.permute.xlu0 %759 }
 0xb27   :  { %v762_v55 = vadd.f32 %v760_v20, %v756_v54 }
 0xb29   :  { %1474 = vtanh.f32 %v762_v55 }
 0xb33   :  { %v1475_v21 = vpop.eup %1474 }
 0xb34   :  { %v764_v22 = vmul.f32 %v1475_v21, %v1471_v15  ;;  %v1559_v21 = vmov 0.0|0.0  }
 0xb35   :  { %1386 = vmatprep.subr.bf16.mxu1 %v1559_v21 }
 0xb36   :  { %766 = vrot.lane.b32.xlu1 %v764_v22, %s1558_s0 }
 0xba8   :  { %v767_v23 = vpop.permute.xlu1 %766 }
 0xba9   :  { %1216 = vmatmul.mubr.msk.f32.vlgmr.msra.gmra.mrb[8].mxu0 %vm235_vm4, %v767_v23  ;;  %v1081_v23 = vld [vmem:[%s1856_s4 + $0x18] sm:$0xff] }
 0xbaa   :  { %1373 = vmatpush1.bf16.msra.mxu0 %v1682_v31  ;;  %1048 = vmatprep.mubr.f32.mxu0 %v1557_v0 }
 0xbab   :  { %1375 = vmatprep.subr.bf16.mxu0 %v1684_v32 }
 0xbae   :  { %1377 = vmatpush1.bf16.msra.mxu0 %v1689_v39 }
 0xbaf   :  { %1379 = vmatprep.subr.bf16.mxu0 %v1693_v45 }
 0xbb2   :  { %1381 = vmatpush1.bf16.msra.mxu0 %v1698_v52 }
 0xbb3   :  { %1383 = vmatprep.subr.bf16.mxu0 %v1702_v53 }
 0xbb6   :  { %1385 = vmatpush1.bf16.msra.mxu0 %v1706_v60 }
 0xc7c   :  { %v844_v24 = vpop.f32.mrb[8].mxu0 }
 0xc7d   :  { %v845_v25 = vadd.f32 %v844_v24, %v1664_v58  ;;  %v846_v41 = vpop.f32.mrb[9].mxu0 }
 0xc7e   :  { %v847_v31 = vadd.f32 %v846_v41, %v1667_v59  ;;  %v1083_v41 = vld [vmem:[%s1856_s4 + $0x28] sm:$0xff] }
 0xc7f   :  { %v1217_v33 = vmul.f32 -1.442695, %v845_v25  ;;  %v1082_v25 = vld [vmem:[%s1856_s4 + $0x20] sm:$0xff] }
 0xc80   :  { %v1218_v44 = vmul.f32 -1.442695, %v847_v31  ;;  %v1393_v31 = vpack.c.bf16 %v1083_v41, %v1082_v25 }
 0xc81   :  { %1476 = vpow2.f32 %v1217_v33  ;;  %v1084_v33 = vld [vmem:[%s1856_s4 + $0x30] sm:$0xff] }
 0xc82   :  { %1478 = vpow2.f32 %v1218_v44 }
 0xc8b   :  { %v1477_v32 = vpop.eup %1476 }
 0xc8c   :  { %v1479_v39 = vpop.eup %1478  ;;  %v855_v45 = vadd.f32 1.0, %v1477_v32 }
 0xc8d   :  { %v856_v26 = vadd.f32 1.0, %v1479_v39 }
 0xc8f   :  { %1480 = vrcp.f32 %v856_v26 }
 0xc90   :  { %1482 = vrcp.f32 %v855_v45 }
 0xc99   :  { %v1481_v52 = vpop.eup %1480 }
 0xc9a   :  { %v861_v53 = vmul.f32 2.0, %v1481_v52  ;;  %v1483_v60 = vpop.eup %1482 }
 0xc9b   :  { %v863_v58 = vmul.f32 %v1483_v60, %v762_v55  ;;  %v1080_v55 = vld [vmem:[%s1856_s4 + $0x10] sm:$0xff] }
 0xc9c   :  { %v1219_v37 = vadd.f32 -1.0, %v861_v53  ;;  %v1390_v24 = vpack.c.bf16 %v1081_v23, %v1080_v55 }
 0xc9e   :  { %v864_v28 = vmul.f32 %v1483_v60, %v1219_v37  ;;  %v1228_v37 = vld [vmem:[%s1857_s5] ss:$0 sm:$0xff] }
 0xca0   :  { %866 = vrot.lane.b32.xlu0 %v864_v28, %s1558_s0 }
 0xd12   :  { %v867_v29 = vpop.permute.xlu0 %866 }
 0xd13   :  { %v869_v59 = vadd.f32 %v867_v29, %v863_v58 }
 0xd15   :  { %1484 = vtanh.f32 %v869_v59 }
 0xd1f   :  { %v1485_v30 = vpop.eup %1484 }
 0xd20   :  { %v871_v34 = vmul.f32 %v1485_v30, %v1481_v52 }
 0xd22   :  { %873 = vrot.lane.b32.xlu1 %v871_v34, %s1558_s0 }
 0xd94   :  { %v874_v35 = vpop.permute.xlu1 %873 }
 0xd95   :  { %1220 = vmatmul.mubr.msk.f32.vlgmr.msra.gmra.mrb[6].mxu1 %vm235_vm4, %v874_v35 }
 0xd96   :  { %1255 = vmatprep.mubr.msk.f32.mxu1 %vm1560_vm5, %v1557_v0  ;;  %v1085_v0 = vld [vmem:[%s1856_s4 + $0x38] sm:$0xff] }
 0xd97   :  { %v1396_v44 = vpack.c.bf16 %v1085_v0, %v1084_v33 }
 0xe68   :  { %v951_v36 = vpop.f32.mrb[6].mxu1 }
 0xe69   :  { %v952_v38 = vadd.f32 %v951_v36, %v1670_v63  ;;  %v953_v42 = vpop.f32.mrb[7].mxu1 }
 0xe6a   :  { %v954_v47 = vadd.f32 %v953_v42, %v1673_v2 }
 0xe6b   :  { %v1221_v48 = vmul.f32 -1.442695, %v952_v38 }
 0xe6c   :  { %v1222_v49 = vmul.f32 -1.442695, %v954_v47 }
 0xe6d   :  { %1486 = vpow2.f32 %v1221_v48 }
 0xe6e   :  { %1488 = vpow2.f32 %v1222_v49 }
 0xe77   :  { %v1487_v51 = vpop.eup %1486 }
 0xe78   :  { %v1489_v56 = vpop.eup %1488  ;;  %v962_v27 = vadd.f32 1.0, %v1487_v51 }
 0xe79   :  { %v963_v57 = vadd.f32 1.0, %v1489_v56 }
 0xe7b   :  { %1490 = vrcp.f32 %v963_v57 }
 0xe7c   :  { %1492 = vrcp.f32 %v962_v27 }
 0xe85   :  { %v1491_v61 = vpop.eup %1490 }
 0xe86   :  { %v968_v46 = vmul.f32 2.0, %v1491_v61  ;;  %v1493_v50 = vpop.eup %1492 }
 0xe87   :  { %v970_v63 = vmul.f32 %v1493_v50, %v869_v59 }
 0xe88   :  { %v1223_v62 = vadd.f32 -1.0, %v968_v46 }
 0xe8a   :  { %v971_v1 = vmul.f32 %v1493_v50, %v1223_v62 }
 0xe8c   :  { %973 = vrot.lane.b32.xlu0 %v971_v1, %s1558_s0 }
 0xefe   :  { %v974_v3 = vpop.permute.xlu0 %973 }
 0xeff   :  { %v976_v2 = vadd.f32 %v974_v3, %v970_v63 }
 0xf01   :  { %1494 = vtanh.f32 %v976_v2 }
 0xf0b   :  { %v1495_v4 = vpop.eup %1494 }
 0xf0c   :  { %v978_v40 = vmul.f32 %v1495_v4, %v1491_v61 }
 0xf0e   :  { %980 = vrot.lane.b32.xlu1 %v978_v40, %s1558_s0 }
 0xf80   :  { %v981_v5 = vpop.permute.xlu1 %980 }
 0xf81   :  { %1224 = vmatmul.mubr.msk.f32.vlgmr.msra.gmra.mrb[10].mxu0 %vm235_vm4, %v981_v5 }
0x1054   :  { %v1050_v43 = vpop.f32.mrb[10].mxu0 }
0x1055   :  { %v1051_v6 = vadd.f32 %v1050_v43, %v1625_v10  ;;  %v1052_v7 = vpop.f32.mrb[11].mxu0  ;;  %v1078_v10 = vld [vmem:[%s1856_s4] sm:$0xff] }
0x1056   :  { %v1053_v8 = vadd.f32 %v1052_v7, %v1627_v11  ;;  %v1079_v11 = vld [vmem:[%s1856_s4 + $0x8] sm:$0xff]  ;;  %s1561_s4 = smov [#allocation5]  }
0x1057   :  { %v1225_v9 = vmul.f32 -1.442695, %v1051_v6  ;;  %v1387_v22 = vpack.c.bf16 %v1079_v11, %v1078_v10  ;;  %s1176_s10 = sshll.u32 %s1561_s4, 4  ;;  %s1177_s10 = int_to_ptr.vmem [resolvable:$true] %s1176_s10 }
0x1058   :  { %v1226_v12 = vmul.f32 -1.442695, %v1053_v8  ;;  %s1528_s11 = scalar_lea.vmem %s1177_s10, 32  ;;  %p1533_p9 = scmp.lt.s32.totalorder %s1177_s10, %s1177_s10 }
0x1059   :  { %1496 = vpow2.f32 %v1225_v9  ;;  %1388 = vmatpush3.bf16.msra.mxu1 %v1387_v22  ;;  %p1529_p8 = scmp.ne.s32.totalorder %s1177_s10, %s1528_s11  ;;  %p1534_p10 = scmp.lt.s32.totalorder %s1528_s11, %s1528_s11 }
0x105a   :  { %1498 = vpow2.f32 %v1226_v12  ;;  %1389 = vmatprep.subr.bf16.mxu1 %v1559_v21 }
0x105b   :  { %p1535_p11 = por %p1534_p10, %p1533_p9 }
0x105d   :  { %1391 = vmatpush3.bf16.msra.mxu1 %v1390_v24  ;;  %p1536_p12 = pnand %p1535_p11, %p1529_p8 }
0x105e   :  { %1392 = vmatprep.subr.bf16.mxu1 %v1559_v21 }
0x1061   :  { %1394 = vmatpush3.bf16.msra.mxu1 %v1393_v31 }
0x1062   :  { %1395 = vmatprep.subr.bf16.mxu1 %v1559_v21 }
0x1063   :  { %v1497_v13 = vpop.eup %1496 }
0x1064   :  { %v1499_v14 = vpop.eup %1498  ;;  %v1061_v16 = vadd.f32 1.0, %v1497_v13 }
0x1065   :  { %v1062_v15 = vadd.f32 1.0, %v1499_v14  ;;  %1397 = vmatpush3.bf16.msra.mxu1 %v1396_v44 }
0x1067   :  { %1500 = vrcp.f32 %v1062_v15 }
0x1068   :  { %1502 = vrcp.f32 %v1061_v16 }
0x1071   :  { %v1501_v17 = vpop.eup %1500 }
0x1072   :  { %v1067_v18 = vmul.f32 2.0, %v1501_v17  ;;  %v1503_v54 = vpop.eup %1502 }
0x1073   :  { %v1069_v32 = vmul.f32 %v1503_v54, %v976_v2 }
0x1074   :  { %v1227_v19 = vadd.f32 -1.0, %v1067_v18 }
0x1076   :  { %v1070_v20 = vmul.f32 %v1503_v54, %v1227_v19 }
0x1078   :  { %1072 = vrot.lane.b32.xlu0 %v1070_v20, %s1558_s0 }
0x10ea   :  { %v1073_v39 = vpop.permute.xlu0 %1072 }
0x10eb   :  { %v1075_v26 = vadd.f32 %v1073_v39, %v1069_v32 }
0x10ed   :  { %1504 = vtanh.f32 %v1075_v26 }
0x10f7   :  { %v1505_v45 = vpop.eup %1504 }
0x10f8   :  { %v1077_v52 = vmul.f32 %v1505_v45, %v1501_v17 }
0x10fa   :  { %1094 = vrot.lane.b32.xlu1 %v1077_v52, %s1558_s0 }
0x116c   :  { %v1095_v53 = vpop.permute.xlu1 %1094 }
0x116d   :  { %1256 = vmatmul.mubr.msk.f32.vlgmr.msra.gmra.mrb[8].mxu1 %vm235_vm4, %v1095_v53 }
0x1240   :  { %v1164_v60 = vpop.f32.mrb[8].mxu1 }
0x1241   :  { %v1165_v28 = vadd.f32 %v1228_v37, %v1164_v60  ;;  %v1257_v58 = vpop.f32.mrb[9].mxu1 }
0x1243   :  { %1169 = vst.msk [vmem:[#allocation5] sm:$0x3] %vm1168_vm6, %v1165_v28 }
0x1244   :  { %1539 = shalt.err (!%p1536_p12)
}
0x1245   :  { %s1540_s14 = scalar_lea.hbm %s1858_s6, 32 }
0x1246   :  { %p1541_p13 = scmp.ne.s32.totalorder %s1858_s6, %s1540_s14  ;;  %p1544_p0 = scmp.lt.u32.totalorder %s1540_s14, %s1858_s6 }
0x1248   :  { %p1546_p1 = pnand %p1544_p0, %p1541_p13 }
0x124a   :  { %1549 = shalt.err (!%p1546_p1)
}
0x124b   :  { %1179 = dma.vmem_to_hbm [thread:$0]  %s1177_s10, 32, %s1858_s6, [#allocation4]  }
0x124c   :  { %1552 = dma.done.wait [#allocation4], 32  }
0x124d   :  { %1553 = vsyncadd [#allocation4], 4294967264 }
0x124e   :  { %1183 = vsyncpa [#allocation3], 1 }
0x124f   :  { %1184 = vsyncpa [#allocation4], 1 }

</bundles_post_ra>
